<compile_context>
chip_gen: v7x
topology: tpu7x:2x2x1
jax: 0.10.0
libtpu: 0.0.40
codegen_flags: <defaults>
</compile_context>

<pallas_src>
import functools

import jax
import jax.numpy as jnp
from jax import lax
from jax.experimental import pallas as pl
from jax.experimental.pallas import tpu as pltpu


def bert_att_output_kernel(h_ref, res_ref, w_ref, b_ref, g_ref, beta_ref,
                           o_ref, *, eps: float):
    # h_ref:   (TM, H) hidden_states tile (native/compute dtype)
    # res_ref: (TM, H) residual tile
    # w_ref:   (H, H)  dense weight, PRE-TRANSPOSED to [in, out] (resident)
    # b_ref:   (1, H)  dense bias (f32)
    # g_ref:   (1, H)  LayerNorm gamma (f32)
    # beta_ref:(1, H)  LayerNorm beta (f32)

    # Dense: plain [TM,K]@[K,N] -> MXU, f32 accumulation; no in-kernel transpose.
    y = jnp.dot(h_ref[...], w_ref[...], preferred_element_type=jnp.float32)
    y = y + b_ref[...]

    # Dropout: eval mode -> identity.

    # Residual add (f32 epilogue).
    x = y + res_ref[...].astype(jnp.float32)

    # LayerNorm over hidden dim, one-pass stats, biased variance, eps=1e-12.
    mean = jnp.mean(x, axis=-1, keepdims=True)
    mean_sq = jnp.mean(x * x, axis=-1, keepdims=True)
    var = jnp.maximum(mean_sq - mean * mean, 0.0)
    inv = lax.rsqrt(var + eps)
    o_ref[...] = ((x - mean) * inv * g_ref[...] + beta_ref[...]).astype(o_ref.dtype)


def _vmem_capacity_bytes() -> int:
    try:
        info = pltpu.get_tpu_info()
        cap = getattr(info, "vmem_capacity_bytes", None)
        if cap:
            return int(cap)
    except Exception:
        pass
    return 128 * 1024 * 1024  # v5e/v6e default


def _vmem_need(tm: int, H: int, act_bytes: int, w_bytes: int,
               out_bytes: int) -> int:
    resident = H * H * w_bytes + 3 * H * 4                 # weight + bias/gamma/beta (single-buffered)
    streamed = 2 * (2 * tm * H * act_bytes + tm * H * out_bytes)  # double-buffered h/res/out tiles
    epilogue = 3 * tm * H * 4                              # f32 y / x / temporaries
    return resident + streamed + epilogue


def _pick_token_tile(T: int, H: int, act_bytes: int, w_bytes: int,
                     out_bytes: int, vmem_budget: int) -> int:
    for tm in (2048, 1024, 512, 256, 128):
        if tm > T:
            continue
        # Prefer >= 2 grid steps when possible so both v7x TCs get work.
        if T >= 256 and pl.cdiv(T, tm) < 2:
            continue
        if _vmem_need(tm, H, act_bytes, w_bytes, out_bytes) <= vmem_budget:
            return tm
    return min(T, 128)


def bert_att_output(hidden_states, input_tensor, weight, bias, gamma, beta,
                    *, eps=1e-12, compute_dtype=None):
    """hidden_states, input_tensor: [B, S, H]; weight: [H, H] PyTorch layout
    (out = x @ weight.T + bias); bias/gamma/beta: [H].

    compute_dtype: optional (e.g. jnp.bfloat16) activation/weight I/O dtype for
    memory-bound generations (v5e/v6e); None keeps the input dtype/semantics.
    """
    B, S, H = hidden_states.shape
    T = B * S

    act_dtype = compute_dtype if compute_dtype is not None else hidden_states.dtype
    out_dtype = act_dtype

    h2 = hidden_states.reshape(T, H).astype(act_dtype)
    r2 = input_tensor.reshape(T, H).astype(act_dtype)
    # Pre-transpose the weight ONCE ([out,in] -> [in,out]); amortized over all steps.
    w_t = jnp.transpose(weight).astype(act_dtype)

    # Small params: cast once in the wrapper (kernel never re-casts per step).
    b2 = bias.reshape(1, H).astype(jnp.float32)
    g2 = gamma.reshape(1, H).astype(jnp.float32)
    bt2 = beta.reshape(1, H).astype(jnp.float32)

    act_bytes = jnp.dtype(act_dtype).itemsize
    w_bytes = jnp.dtype(w_t.dtype).itemsize
    out_bytes = jnp.dtype(out_dtype).itemsize

    # Generation-aware VMEM budget: ~51 MiB usable on v7x (64 MiB physical),
    # ~102 MiB on v5e/v6e (128 MiB physical).
    usable = int(_vmem_capacity_bytes() * 0.8)
    TM = _pick_token_tile(T, H, act_bytes, w_bytes, out_bytes, usable)
    need = _vmem_need(TM, H, act_bytes, w_bytes, out_bytes)
    vmem_limit = min(usable, max(int(1.5 * need), 16 << 20))
    vmem_limit = max(vmem_limit, need)  # never clamp below the true requirement

    grid_m = pl.cdiv(T, TM)
    kernel = functools.partial(bert_att_output_kernel, eps=eps)

    def _build(use_buffered: bool):
        def resident_spec(shape, imap):
            if use_buffered:
                return pl.BlockSpec(shape, imap, pipeline_mode=pl.Buffered(1))
            return pl.BlockSpec(shape, imap)

        return pl.pallas_call(
            kernel,
            out_shape=jax.ShapeDtypeStruct((T, H), out_dtype),
            grid_spec=pltpu.PrefetchScalarGridSpec(
                num_scalar_prefetch=0,
                grid=(grid_m,),
                in_specs=[
                    pl.BlockSpec((TM, H), lambda i: (i, 0)),   # hidden_states tile (streamed)
                    pl.BlockSpec((TM, H), lambda i: (i, 0)),   # residual tile (streamed)
                    resident_spec((H, H), lambda i: (0, 0)),   # weight [in,out] (resident)
                    resident_spec((1, H), lambda i: (0, 0)),   # bias
                    resident_spec((1, H), lambda i: (0, 0)),   # gamma
                    resident_spec((1, H), lambda i: (0, 0)),   # beta
                ],
                out_specs=pl.BlockSpec((TM, H), lambda i: (i, 0)),
            ),
            compiler_params=pltpu.CompilerParams(
                dimension_semantics=("parallel",),
                vmem_limit_bytes=int(vmem_limit),
            ),
        )

    have_buffered = hasattr(pl, "Buffered")
    try:
        out2 = _build(have_buffered)(h2, r2, w_t, b2, g2, bt2)
    except Exception:
        if not have_buffered:
            raise
        # Fallback: default (double-buffered) specs for the resident operands.
        out2 = _build(False)(h2, r2, w_t, b2, g2, bt2)

    return out2.reshape(B, S, H)


if __name__ == "__main__":
    # Small demo config: batch=2, seq=8, hidden=32 (NOT the perf configuration;
    # production expects H % 128 == 0).
    B, S, H = 2, 8, 32
    key = jax.random.PRNGKey(0)
    k1, k2, k3, k4 = jax.random.split(key, 4)

    hidden_states = jax.random.normal(k1, (B, S, H), dtype=jnp.float32)
    input_tensor = jax.random.normal(k2, (B, S, H), dtype=jnp.float32)

    # Deterministic synthetic parameters (PyTorch nn.Linear layout [out, in]).
    weight = jax.random.normal(k3, (H, H), dtype=jnp.float32) * 0.02
    bias = jax.random.normal(k4, (H,), dtype=jnp.float32) * 0.02
    gamma = jnp.ones((H,), dtype=jnp.float32)
    beta = jnp.zeros((H,), dtype=jnp.float32)

    out = bert_att_output(hidden_states, input_tensor, weight, bias, gamma, beta)
    out = jax.block_until_ready(out)

    # Pure-JAX reference (dense -> residual -> layernorm, eps=1e-12).
    y = hidden_states @ weight.T + bias
    x = y + input_tensor
    mean = x.mean(-1, keepdims=True)
    var = ((x - mean) ** 2).mean(-1, keepdims=True)
    ref = (x - mean) / jnp.sqrt(var + 1e-12) * gamma + beta
    assert jnp.allclose(out, ref, atol=1e-5, rtol=1e-5), "mismatch vs reference"

    print("KERNEL_OK")
</pallas_src>

<mosaic_0001>
module attributes {stable_mosaic.version = 11 : i64} {
  func.func @bert_att_output_kernel(%arg0: i32, %arg1: memref<16x32xf32, #tpu.memory_space<vmem>>, %arg2: memref<16x32xf32, #tpu.memory_space<vmem>>, %arg3: memref<32x32xf32, #tpu.memory_space<vmem>>, %arg4: memref<1x32xf32, #tpu.memory_space<vmem>>, %arg5: memref<1x32xf32, #tpu.memory_space<vmem>>, %arg6: memref<1x32xf32, #tpu.memory_space<vmem>>, %arg7: memref<16x32xf32, #tpu.memory_space<vmem>>) attributes {dimension_semantics = [#tpu.dimension_semantics<parallel>], iteration_bounds = array<i64: 1>, scalar_prefetch = 0 : i64, scratch_operands = 0 : i64, tpu.core_type = #tpu.core_type<tc>, window_params = [{transform_indices = @transform_0, window_bounds = array<i64: 16, 32>}, {transform_indices = @transform_1, window_bounds = array<i64: 16, 32>}, {pipeline_mode = #tpu.pipeline_mode<synchronous>, transform_indices = @transform_2, window_bounds = array<i64: 32, 32>}, {pipeline_mode = #tpu.pipeline_mode<synchronous>, transform_indices = @transform_3, window_bounds = array<i64: 1, 32>}, {pipeline_mode = #tpu.pipeline_mode<synchronous>, transform_indices = @transform_4, window_bounds = array<i64: 1, 32>}, {pipeline_mode = #tpu.pipeline_mode<synchronous>, transform_indices = @transform_5, window_bounds = array<i64: 1, 32>}, {transform_indices = @transform_6, window_bounds = array<i64: 16, 32>}]} {
    %c0 = arith.constant 0 : index
    %c0_0 = arith.constant 0 : index
    %0 = vector.load %arg1[%c0, %c0_0] : memref<16x32xf32, #tpu.memory_space<vmem>>, vector<16x32xf32>
    %c0_1 = arith.constant 0 : index
    %c0_2 = arith.constant 0 : index
    %1 = vector.load %arg3[%c0_1, %c0_2] : memref<32x32xf32, #tpu.memory_space<vmem>>, vector<32x32xf32>
    %cst = arith.constant dense<0.000000e+00> : vector<16x32xf32>
    %2 = tpu.matmul %0, %1, %cst {dimension_numbers = #tpu.dot_dimension_numbers<[1], [0], [0], [1], [0, 0, 1, 1], [], []>} : vector<16x32xf32>, vector<32x32xf32>, vector<16x32xf32> -> vector<16x32xf32>
    %c0_3 = arith.constant 0 : index
    %c0_4 = arith.constant 0 : index
    %3 = vector.load %arg4[%c0_3, %c0_4] : memref<1x32xf32, #tpu.memory_space<vmem>>, vector<1x32xf32>
    %4 = vector.broadcast %3 : vector<1x32xf32> to vector<16x32xf32>
    %5 = arith.addf %2, %4 : vector<16x32xf32>
    %c0_5 = arith.constant 0 : index
    %c0_6 = arith.constant 0 : index
    %6 = vector.load %arg2[%c0_5, %c0_6] : memref<16x32xf32, #tpu.memory_space<vmem>>, vector<16x32xf32>
    %7 = arith.addf %5, %6 : vector<16x32xf32>
    %cst_7 = arith.constant dense<0.000000e+00> : vector<16xf32>
    %8 = vector.multi_reduction <add>, %7, %cst_7 [1] : vector<16x32xf32> to vector<16xf32>
    %9 = vector.shape_cast %8 : vector<16xf32> to vector<16x1xf32>
    %cst_8 = arith.constant 3.200000e+01 : f32
    %10 = vector.broadcast %cst_8 : f32 to vector<16x1xf32>
    %11 = arith.divf %9, %10 : vector<16x1xf32>
    %12 = arith.mulf %7, %7 : vector<16x32xf32>
    %cst_9 = arith.constant dense<0.000000e+00> : vector<16xf32>
    %13 = vector.multi_reduction <add>, %12, %cst_9 [1] : vector<16x32xf32> to vector<16xf32>
    %14 = vector.shape_cast %13 : vector<16xf32> to vector<16x1xf32>
    %cst_10 = arith.constant 3.200000e+01 : f32
    %15 = vector.broadcast %cst_10 : f32 to vector<16x1xf32>
    %16 = arith.divf %14, %15 : vector<16x1xf32>
    %17 = arith.mulf %11, %11 : vector<16x1xf32>
    %18 = arith.subf %16, %17 : vector<16x1xf32>
    %cst_11 = arith.constant 0.000000e+00 : f32
    %19 = vector.broadcast %cst_11 : f32 to vector<16x1xf32>
    %20 = arith.maximumf %18, %19 : vector<16x1xf32>
    %cst_12 = arith.constant 9.99999996E-13 : f32
    %21 = vector.broadcast %cst_12 : f32 to vector<16x1xf32>
    %22 = arith.addf %20, %21 : vector<16x1xf32>
    %23 = math.rsqrt %22 : vector<16x1xf32>
    %24 = vector.broadcast %11 : vector<16x1xf32> to vector<16x32xf32>
    %25 = arith.subf %7, %24 : vector<16x32xf32>
    %26 = vector.broadcast %23 : vector<16x1xf32> to vector<16x32xf32>
    %27 = arith.mulf %25, %26 : vector<16x32xf32>
    %c0_13 = arith.constant 0 : index
    %c0_14 = arith.constant 0 : index
    %28 = vector.load %arg5[%c0_13, %c0_14] : memref<1x32xf32, #tpu.memory_space<vmem>>, vector<1x32xf32>
    %29 = vector.broadcast %28 : vector<1x32xf32> to vector<16x32xf32>
    %30 = arith.mulf %27, %29 : vector<16x32xf32>
    %c0_15 = arith.constant 0 : index
    %c0_16 = arith.constant 0 : index
    %31 = vector.load %arg6[%c0_15, %c0_16] : memref<1x32xf32, #tpu.memory_space<vmem>>, vector<1x32xf32>
    %32 = vector.broadcast %31 : vector<1x32xf32> to vector<16x32xf32>
    %33 = arith.addf %30, %32 : vector<16x32xf32>
    %c0_17 = arith.constant 0 : index
    %c0_18 = arith.constant 0 : index
    %34 = vector.load %arg7[%c0_17, %c0_18] : memref<16x32xf32, #tpu.memory_space<vmem>>, vector<16x32xf32>
    tpu.vector_store %arg7[%c0_17, %c0_18], %33 {strides = array<i32>} : memref<16x32xf32, #tpu.memory_space<vmem>>, vector<16x32xf32>,
    return
  }
  func.func @transform_0(%arg0: i32) -> (i32, i32) {
    %c0_i32 = arith.constant 0 : i32
    %c0_i32_0 = arith.constant 0 : i32
    return %arg0, %c0_i32 : i32, i32
  }
  func.func @transform_1(%arg0: i32) -> (i32, i32) {
    %c0_i32 = arith.constant 0 : i32
    %c0_i32_0 = arith.constant 0 : i32
    return %arg0, %c0_i32 : i32, i32
  }
  func.func @transform_2(%arg0: i32) -> (i32, i32) {
    %c0_i32 = arith.constant 0 : i32
    %c0_i32_0 = arith.constant 0 : i32
    %c0_i32_1 = arith.constant 0 : i32
    return %c0_i32, %c0_i32_0 : i32, i32
  }
  func.func @transform_3(%arg0: i32) -> (i32, i32) {
    %c0_i32 = arith.constant 0 : i32
    %c0_i32_0 = arith.constant 0 : i32
    %c0_i32_1 = arith.constant 0 : i32
    return %c0_i32, %c0_i32_0 : i32, i32
  }
  func.func @transform_4(%arg0: i32) -> (i32, i32) {
    %c0_i32 = arith.constant 0 : i32
    %c0_i32_0 = arith.constant 0 : i32
    %c0_i32_1 = arith.constant 0 : i32
    return %c0_i32, %c0_i32_0 : i32, i32
  }
  func.func @transform_5(%arg0: i32) -> (i32, i32) {
    %c0_i32 = arith.constant 0 : i32
    %c0_i32_0 = arith.constant 0 : i32
    %c0_i32_1 = arith.constant 0 : i32
    return %c0_i32, %c0_i32_0 : i32, i32
  }
  func.func @transform_6(%arg0: i32) -> (i32, i32) {
    %c0_i32 = arith.constant 0 : i32
    %c0_i32_0 = arith.constant 0 : i32
    return %arg0, %c0_i32 : i32, i32
  }
}

module attributes {stable_mosaic.version = 11 : i64} {
  func.func @bert_att_output_kernel(%arg0: i32, %arg1: memref<16x32xf32, #tpu.memory_space<vmem>>, %arg2: memref<16x32xf32, #tpu.memory_space<vmem>>, %arg3: memref<32x32xf32, #tpu.memory_space<vmem>>, %arg4: memref<1x32xf32, #tpu.memory_space<vmem>>, %arg5: memref<1x32xf32, #tpu.memory_space<vmem>>, %arg6: memref<1x32xf32, #tpu.memory_space<vmem>>, %arg7: memref<16x32xf32, #tpu.memory_space<vmem>>) attributes {dimension_semantics = [#tpu.dimension_semantics<parallel>], iteration_bounds = array<i64: 1>, scalar_prefetch = 0 : i64, scratch_operands = 0 : i64, tpu.core_type = #tpu.core_type<tc>, window_params = [{transform_indices = @transform_0, window_bounds = array<i64: 16, 32>}, {transform_indices = @transform_1, window_bounds = array<i64: 16, 32>}, {pipeline_mode = #tpu.pipeline_mode<synchronous>, transform_indices = @transform_2, window_bounds = array<i64: 32, 32>}, {pipeline_mode = #tpu.pipeline_mode<synchronous>, transform_indices = @transform_3, window_bounds = array<i64: 1, 32>}, {pipeline_mode = #tpu.pipeline_mode<synchronous>, transform_indices = @transform_4, window_bounds = array<i64: 1, 32>}, {pipeline_mode = #tpu.pipeline_mode<synchronous>, transform_indices = @transform_5, window_bounds = array<i64: 1, 32>}, {transform_indices = @transform_6, window_bounds = array<i64: 16, 32>}]} {
    %c0 = arith.constant 0 : index
    %c0_0 = arith.constant 0 : index
    %0 = vector.load %arg1[%c0, %c0_0] : memref<16x32xf32, #tpu.memory_space<vmem>>, vector<16x32xf32>
    %c0_1 = arith.constant 0 : index
    %c0_2 = arith.constant 0 : index
    %1 = vector.load %arg3[%c0_1, %c0_2] : memref<32x32xf32, #tpu.memory_space<vmem>>, vector<32x32xf32>
    %cst = arith.constant dense<0.000000e+00> : vector<16x32xf32>
    %2 = tpu.matmul %0, %1, %cst {dimension_numbers = #tpu.dot_dimension_numbers<[1], [0], [0], [1], [0, 0, 1, 1], [], []>} : vector<16x32xf32>, vector<32x32xf32>, vector<16x32xf32> -> vector<16x32xf32>
    %c0_3 = arith.constant 0 : index
    %c0_4 = arith.constant 0 : index
    %3 = vector.load %arg4[%c0_3, %c0_4] : memref<1x32xf32, #tpu.memory_space<vmem>>, vector<1x32xf32>
    %4 = vector.broadcast %3 : vector<1x32xf32> to vector<16x32xf32>
    %5 = arith.addf %2, %4 : vector<16x32xf32>
    %c0_5 = arith.constant 0 : index
    %c0_6 = arith.constant 0 : index
    %6 = vector.load %arg2[%c0_5, %c0_6] : memref<16x32xf32, #tpu.memory_space<vmem>>, vector<16x32xf32>
    %7 = arith.addf %5, %6 : vector<16x32xf32>
    %cst_7 = arith.constant dense<0.000000e+00> : vector<16xf32>
    %8 = vector.multi_reduction <add>, %7, %cst_7 [1] : vector<16x32xf32> to vector<16xf32>
    %9 = vector.shape_cast %8 : vector<16xf32> to vector<16x1xf32>
    %cst_8 = arith.constant 3.200000e+01 : f32
    %10 = vector.broadcast %cst_8 : f32 to vector<16x1xf32>
    %11 = arith.divf %9, %10 : vector<16x1xf32>
    %12 = arith.mulf %7, %7 : vector<16x32xf32>
    %cst_9 = arith.constant dense<0.000000e+00> : vector<16xf32>
    %13 = vector.multi_reduction <add>, %12, %cst_9 [1] : vector<16x32xf32> to vector<16xf32>
    %14 = vector.shape_cast %13 : vector<16xf32> to vector<16x1xf32>
    %cst_10 = arith.constant 3.200000e+01 : f32
    %15 = vector.broadcast %cst_10 : f32 to vector<16x1xf32>
    %16 = arith.divf %14, %15 : vector<16x1xf32>
    %17 = arith.mulf %11, %11 : vector<16x1xf32>
    %18 = arith.subf %16, %17 : vector<16x1xf32>
    %cst_11 = arith.constant 0.000000e+00 : f32
    %19 = vector.broadcast %cst_11 : f32 to vector<16x1xf32>
    %20 = arith.maximumf %18, %19 : vector<16x1xf32>
    %cst_12 = arith.constant 9.99999996E-13 : f32
    %21 = vector.broadcast %cst_12 : f32 to vector<16x1xf32>
    %22 = arith.addf %20, %21 : vector<16x1xf32>
    %23 = math.rsqrt %22 : vector<16x1xf32>
    %24 = vector.broadcast %11 : vector<16x1xf32> to vector<16x32xf32>
    %25 = arith.subf %7, %24 : vector<16x32xf32>
    %26 = vector.broadcast %23 : vector<16x1xf32> to vector<16x32xf32>
    %27 = arith.mulf %25, %26 : vector<16x32xf32>
    %c0_13 = arith.constant 0 : index
    %c0_14 = arith.constant 0 : index
    %28 = vector.load %arg5[%c0_13, %c0_14] : memref<1x32xf32, #tpu.memory_space<vmem>>, vector<1x32xf32>
    %29 = vector.broadcast %28 : vector<1x32xf32> to vector<16x32xf32>
    %30 = arith.mulf %27, %29 : vector<16x32xf32>
    %c0_15 = arith.constant 0 : index
    %c0_16 = arith.constant 0 : index
    %31 = vector.load %arg6[%c0_15, %c0_16] : memref<1x32xf32, #tpu.memory_space<vmem>>, vector<1x32xf32>
    %32 = vector.broadcast %31 : vector<1x32xf32> to vector<16x32xf32>
    %33 = arith.addf %30, %32 : vector<16x32xf32>
    %c0_17 = arith.constant 0 : index
    %c0_18 = arith.constant 0 : index
    %34 = vector.load %arg7[%c0_17, %c0_18] : memref<16x32xf32, #tpu.memory_space<vmem>>, vector<16x32xf32>
    tpu.vector_store %arg7[%c0_17, %c0_18], %33 {strides = array<i32>} : memref<16x32xf32, #tpu.memory_space<vmem>>, vector<16x32xf32>,
    return
  }
  func.func @transform_0(%arg0: i32) -> (i32, i32) {
    %c0_i32 = arith.constant 0 : i32
    %c0_i32_0 = arith.constant 0 : i32
    return %arg0, %c0_i32 : i32, i32
  }
  func.func @transform_1(%arg0: i32) -> (i32, i32) {
    %c0_i32 = arith.constant 0 : i32
    %c0_i32_0 = arith.constant 0 : i32
    return %arg0, %c0_i32 : i32, i32
  }
  func.func @transform_2(%arg0: i32) -> (i32, i32) {
    %c0_i32 = arith.constant 0 : i32
    %c0_i32_0 = arith.constant 0 : i32
    %c0_i32_1 = arith.constant 0 : i32
    return %c0_i32, %c0_i32_0 : i32, i32
  }
  func.func @transform_3(%arg0: i32) -> (i32, i32) {
    %c0_i32 = arith.constant 0 : i32
    %c0_i32_0 = arith.constant 0 : i32
    %c0_i32_1 = arith.constant 0 : i32
    return %c0_i32, %c0_i32_0 : i32, i32
  }
  func.func @transform_4(%arg0: i32) -> (i32, i32) {
    %c0_i32 = arith.constant 0 : i32
    %c0_i32_0 = arith.constant 0 : i32
    %c0_i32_1 = arith.constant 0 : i32
    return %c0_i32, %c0_i32_0 : i32, i32
  }
  func.func @transform_5(%arg0: i32) -> (i32, i32) {
    %c0_i32 = arith.constant 0 : i32
    %c0_i32_0 = arith.constant 0 : i32
    %c0_i32_1 = arith.constant 0 : i32
    return %c0_i32, %c0_i32_0 : i32, i32
  }
  func.func @transform_6(%arg0: i32) -> (i32, i32) {
    %c0_i32 = arith.constant 0 : i32
    %c0_i32_0 = arith.constant 0 : i32
    return %arg0, %c0_i32 : i32, i32
  }
}

</mosaic_0001>

<bundles_post_ra>
// kernel: tpu_custom_call.1
= control target key start
LH: loop header
LB: loop body
LE: loop exit
PB: predicated region body
PF: predicated region fallthrough
CT: control target
= control target key end

     0   :  { %11 = vsyncpa [#allocation3], 0  ;;  %s494_s0 = inlined_call_operand.hbm [shape: f32[16,32], index: 0, kind: input, shape index: {}]   ;;  %s495_s1 = inlined_call_operand.hbm [shape: f32[16,32], index: 1, kind: input, shape index: {}]   ;;  %s496_s2 = inlined_call_operand.hbm [shape: f32[32,32], index: 2, kind: input, shape index: {}]   ;;  %s497_s3 = inlined_call_operand.vmem [shape: f32[1,32], index: 3, kind: input, shape index: {}]   ;;  %s498_s4 = inlined_call_operand.vmem [shape: f32[1,32], index: 4, kind: input, shape index: {}]   ;;  %s499_s5 = inlined_call_operand.vmem [shape: f32[1,32], index: 5, kind: input, shape index: {}]   ;;  %s500_s6 = inlined_call_operand.hbm [shape: f32[16,32], index: 6, kind: output, shape index: {}]  }
   0x1   :  { %12 = vsyncpa [#allocation6], 0 }
   0x2   :  { %13 = vsyncpa [#allocation4], 0  ;;  %s369_s21 = smov [#allocation5]   ;;  %s370_s23 = smov [#allocation2]  }
   0x3   :  { %s31_s22 = sshll.u32 %s369_s21, 4  ;;  %s19_s24 = sshll.u32 %s370_s23, 4  ;;  %s32_s22 = int_to_ptr.vmem [resolvable:$true] %s31_s22  ;;  %s410_s24 = int_to_ptr.vmem [resolvable:$true] %s19_s24 }
   0x4   :  { %s275_s27 = scalar_lea.hbm %s495_s1, 256 }
   0x5   :  { %p276_p0 = scmp.ne.s32.totalorder %s495_s1, %s275_s27  ;;  %p279_p1 = scmp.lt.u32.totalorder %s275_s27, %s495_s1 }
   0x7   :  { %p281_p2 = pnand %p279_p1, %p276_p0 }
   0x9   :  { %284 = shalt.err (!%p281_p2)
}
   0xa   :  { %s285_s8 = scalar_lea.vmem %s32_s22, 256  ;;  %p290_p4 = scmp.lt.s32.totalorder %s32_s22, %s32_s22 }
   0xb   :  { %p286_p3 = scmp.ne.s32.totalorder %s32_s22, %s285_s8  ;;  %p291_p5 = scmp.lt.s32.totalorder %s285_s8, %s285_s8 }
   0xd   :  { %p292_p6 = por %p291_p5, %p290_p4 }
   0xf   :  { %p293_p7 = pnand %p292_p6, %p286_p3 }
  0x11   :  { %296 = shalt.err (!%p293_p7)
}
  0x12   :  { %s371_s9 = smov 128   ;;  %s372_s10 = smov 8  }
  0x13   :  { %37 = dma.hbm_to_vmem [thread:$0]  %s495_s1, 256, %s32_s22, [#allocation6], %s371_s9, %s371_s9, %s372_s10  }
  0x14   :  { %s297_s15 = scalar_lea.hbm %s494_s0, 256 }
  0x15   :  { %p298_p8 = scmp.ne.s32.totalorder %s494_s0, %s297_s15  ;;  %p301_p9 = scmp.lt.u32.totalorder %s297_s15, %s494_s0 }
  0x17   :  { %p303_p10 = pnand %p301_p9, %p298_p8 }
  0x19   :  { %306 = shalt.err (!%p303_p10)
}
  0x1a   :  { %s307_s20 = scalar_lea.vmem %s410_s24, 256  ;;  %p312_p12 = scmp.lt.s32.totalorder %s410_s24, %s410_s24 }
  0x1b   :  { %p308_p11 = scmp.ne.s32.totalorder %s410_s24, %s307_s20  ;;  %p313_p13 = scmp.lt.s32.totalorder %s307_s20, %s307_s20 }
  0x1d   :  { %p314_p0 = por %p313_p13, %p312_p12 }
  0x1f   :  { %p315_p1 = pnand %p314_p0, %p308_p11 }
  0x21   :  { %318 = shalt.err (!%p315_p1)
}
  0x22   :  { %25 = dma.hbm_to_vmem [thread:$0]  %s494_s0, 256, %s410_s24, [#allocation3], %s371_s9, %s371_s9, %s372_s10  }
  0x23   :  { %s373_s22 = smov [#allocation7]   ;;  %s319_s27 = scalar_lea.hbm %s496_s2, 512 }
  0x24   :  { %s43_s23 = sshll.u32 %s373_s22, 4  ;;  %p320_p2 = scmp.ne.s32.totalorder %s496_s2, %s319_s27  ;;  %s44_s23 = int_to_ptr.vmem [resolvable:$true] %s43_s23 }
  0x25   :  { %p323_p3 = scmp.lt.u32.totalorder %s319_s27, %s496_s2 }
  0x27   :  { %p325_p4 = pnand %p323_p3, %p320_p2 }
  0x29   :  { %328 = shalt.err (!%p325_p4)
}
  0x2a   :  { %s329_s8 = scalar_lea.vmem %s44_s23, 512  ;;  %p334_p6 = scmp.lt.s32.totalorder %s44_s23, %s44_s23 }
  0x2b   :  { %p330_p5 = scmp.ne.s32.totalorder %s44_s23, %s329_s8  ;;  %p335_p7 = scmp.lt.s32.totalorder %s329_s8, %s329_s8 }
  0x2d   :  { %p336_p8 = por %p335_p7, %p334_p6 }
  0x2f   :  { %p337_p9 = pnand %p336_p8, %p330_p5 }
  0x31   :  { %340 = shalt.err (!%p337_p9)
}
  0x32   :  { %49 = dma.hbm_to_vmem [thread:$0]  %s496_s2, 512, %s44_s23, [#allocation6], %s371_s9, %s371_s9, %s372_s10  }
  0x33   :  { %363 = dma.done.wait [#allocation3], 256  }
  0x34   :  { %364 = vsyncadd [#allocation3], 4294967040 }
  0x35   :  { %365 = dma.done.wait [#allocation6], 768  }
  0x36   :  { %366 = vsyncadd [#allocation6], 4294966528  ;;  %vm78_vm0 = vcmask 261120   ;;  %v67_v0 = vld [vmem:[#allocation7] sm:$0xff]  ;;  %v68_v1 = vld [vmem:[#allocation7 + $0x8] sm:$0xff]  ;;  %s374_s15 = smov [#allocation8]  }
  0x37   :  { %v69_v2 = vld [vmem:[#allocation7 + $0x10] sm:$0xff]  ;;  %v257_v3 = vpack.c.bf16 %v68_v1, %v67_v0  ;;  %v70_v4 = vld [vmem:[#allocation7 + $0x18] sm:$0xff]  ;;  %v65_v5 = vld [vmem:[#allocation2] sm:$0xff]  ;;  %s222_s16 = sshll.u32 %s374_s15, 4  ;;  %s223_s16 = int_to_ptr.vmem [resolvable:$true] %s222_s16 }
  0x38   :  { %v261_v6 = vpack.c.bf16 %v70_v4, %v69_v2  ;;  %254 = vmatprep.mubr.msk.f32.mxu0 %vm78_vm0, %v65_v5  ;;  %v66_v7 = vld [vmem:[#allocation2 + $0x8] sm:$0xff]  ;;  %v235_v8 = vld [vmem:[%s497_s3] ss:$0 sm:$0xff]  ;;  %v161_v11 = vld [vmem:[#allocation5 + $0x8] sm:$0xff]  ;;  %p346_p11 = scmp.lt.s32.totalorder %s223_s16, %s223_s16 }
  0x39   :  { %258 = vmatprep.subr.bf16.mxu0 %v257_v3  ;;  %v160_v13 = vld [vmem:[#allocation5] sm:$0xff]  ;;  %v238_v41 = vld [vmem:[%s498_s4] ss:$0 sm:$0xff]  ;;  %s341_s4 = scalar_lea.vmem %s223_s16, 256 }
  0x3a   :  { %260 = vmatpush3.bf16.msra.mxu0 %v257_v3  ;;  %v239_v43 = vld [vmem:[%s499_s5] ss:$0 sm:$0xff]  ;;  %p342_p10 = scmp.ne.s32.totalorder %s223_s16, %s341_s4  ;;  %p347_p12 = scmp.lt.s32.totalorder %s341_s4, %s341_s4 }
  0x3b   :  { %262 = vmatprep.subr.bf16.mxu0 %v261_v6 }
  0x3c   :  { %p348_p13 = por %p347_p12, %p346_p11 }
  0x3e   :  { %264 = vmatpush3.bf16.msra.mxu0 %v261_v6  ;;  %p349_p0 = pnand %p348_p13, %p342_p10 }
  0x41   :  { %255 = vmatmul.mubr.msk.f32.vlgmr.msra.gmra.mrb[0].mxu0 %vm78_vm0, %v66_v7 }
 0x114   :  { %v256_v9 = vpop.f32.mrb[0].mxu0 }
 0x115   :  { %v157_v10 = vadd.f32 %v256_v9, %v235_v8  ;;  %v151_v12 = vpop.f32.mrb[1].mxu0 }
 0x116   :  { %v152_v14 = vadd.f32 %v235_v8, %v151_v12 }
 0x117   :  { %v163_v15 = vadd.f32 %v161_v11, %v157_v10 }
 0x118   :  { %v162_v16 = vadd.f32 %v160_v13, %v152_v14 }
 0x119   :  { %v174_v20 = vmul.f32 %v163_v15, %v163_v15  ;;  %v167_v21 = vsel %vm78_vm0, %v163_v15, 0.0 }
 0x11a   :  { %v164_v17 = vsel %vm78_vm0, %v162_v16, 0.0  ;;  %v173_v18 = vmul.f32 %v162_v16, %v162_v16 }
 0x11b   :  { %165 = vadd.xlane.f32.xlu0 %v164_v17  ;;  %v178_v22 = vsel %vm78_vm0, %v174_v20, 0.0 }
 0x11c   :  { %v175_v19 = vsel %vm78_vm0, %v173_v18, 0.0 }
 0x11d   :  { %176 = vadd.xlane.f32.xlu1 %v175_v19 }
 0x11f   :  { %168 = vadd.xlane.f32.xlu0 %v167_v21 }
 0x121   :  { %179 = vadd.xlane.f32.xlu1 %v178_v22 }
 0x1a8   :  { %v166_v23 = vpop.xlane.xlu0 %165 }
 0x1a9   :  { %v171_v24 = vmul.f32 0.03125, %v166_v23 }
 0x1aa   :  { %v177_v25 = vpop.xlane.xlu1 %176 }
 0x1ab   :  { %v183_v26 = vmul.f32 %v171_v24, %v171_v24  ;;  %v181_v27 = vmul.f32 0.03125, %v177_v25  ;;  %v193_v39 = vsub.f32 %v162_v16, %v171_v24 }
 0x1ac   :  { %v169_v28 = vpop.xlane.xlu0 %168 }
 0x1ad   :  { %v185_v29 = vsub.f32 %v181_v27, %v183_v26  ;;  %v172_v30 = vmul.f32 0.03125, %v169_v28 }
 0x1ae   :  { %v180_v31 = vpop.xlane.xlu1 %179 }
 0x1af   :  { %v187_v32 = vmax.f32 %v185_v29, 0.0  ;;  %v184_v33 = vmul.f32 %v172_v30, %v172_v30  ;;  %v182_v34 = vmul.f32 0.03125, %v180_v31  ;;  %v194_v44 = vsub.f32 %v163_v15, %v172_v30 }
 0x1b1   :  { %v189_v35 = vadd.f32 1e-12, %v187_v32  ;;  %v186_v36 = vsub.f32 %v182_v34, %v184_v33 }
 0x1b3   :  { %271 = vrsqrt.f32 %v189_v35  ;;  %v188_v37 = vmax.f32 %v186_v36, 0.0 }
 0x1b5   :  { %v190_v38 = vadd.f32 1e-12, %v188_v37 }
 0x1b7   :  { %273 = vrsqrt.f32 %v190_v38 }
 0x1bd   :  { %v272_v40 = vpop.eup %271 }
 0x1be   :  { %v195_v42 = vmul.f32 %v272_v40, %v193_v39 }
 0x1c0   :  { %v204_v45 = vmul.f32 %v238_v41, %v195_v42 }
 0x1c1   :  { %v274_v46 = vpop.eup %273 }
 0x1c2   :  { %v196_v47 = vmul.f32 %v274_v46, %v194_v44  ;;  %v213_v48 = vadd.f32 %v239_v43, %v204_v45 }
 0x1c4   :  { %v205_v49 = vmul.f32 %v238_v41, %v196_v47  ;;  %215 = vst.msk [vmem:[#allocation8] sm:$0xff] %vm78_vm0, %v213_v48 }
 0x1c6   :  { %v214_v50 = vadd.f32 %v239_v43, %v205_v49 }
 0x1c8   :  { %216 = vst.msk [vmem:[#allocation8 + $0x8] sm:$0xff] %vm78_vm0, %v214_v50 }
 0x1c9   :  { %352 = shalt.err (!%p349_p0)
}
 0x1ca   :  { %s353_s18 = scalar_lea.hbm %s500_s6, 256 }
 0x1cb   :  { %p354_p1 = scmp.ne.s32.totalorder %s500_s6, %s353_s18  ;;  %p357_p2 = scmp.lt.u32.totalorder %s353_s18, %s500_s6 }
 0x1cd   :  { %p359_p3 = pnand %p357_p2, %p354_p1 }
 0x1cf   :  { %362 = shalt.err (!%p359_p3)
}
 0x1d0   :  { %228 = dma.vmem_to_hbm [thread:$0]  %s223_s16, 256, %s500_s6, [#allocation4], %s371_s9, %s371_s9, %s372_s10  }
 0x1d1   :  { %367 = dma.done.wait [#allocation4], 256  }
 0x1d2   :  { %368 = vsyncadd [#allocation4], 4294967040 }
 0x1d3   :  { %232 = vsyncpa [#allocation3], 1 }
 0x1d4   :  { %233 = vsyncpa [#allocation6], 1 }
 0x1d5   :  { %234 = vsyncpa [#allocation4], 1 }

// kernel: tpu_custom_call.1
= control target key start
LH: loop header
LB: loop body
LE: loop exit
PB: predicated region body
PF: predicated region fallthrough
CT: control target
= control target key end

     0   :  { %11 = vsyncpa [#allocation3], 0  ;;  %s494_s0 = inlined_call_operand.hbm [shape: f32[16,32], index: 0, kind: input, shape index: {}]   ;;  %s495_s1 = inlined_call_operand.hbm [shape: f32[16,32], index: 1, kind: input, shape index: {}]   ;;  %s496_s2 = inlined_call_operand.hbm [shape: f32[32,32], index: 2, kind: input, shape index: {}]   ;;  %s497_s3 = inlined_call_operand.vmem [shape: f32[1,32], index: 3, kind: input, shape index: {}]   ;;  %s498_s4 = inlined_call_operand.vmem [shape: f32[1,32], index: 4, kind: input, shape index: {}]   ;;  %s499_s5 = inlined_call_operand.vmem [shape: f32[1,32], index: 5, kind: input, shape index: {}]   ;;  %s500_s6 = inlined_call_operand.hbm [shape: f32[16,32], index: 6, kind: output, shape index: {}]  }
   0x1   :  { %12 = vsyncpa [#allocation6], 0 }
   0x2   :  { %13 = vsyncpa [#allocation4], 0  ;;  %s369_s21 = smov [#allocation5]   ;;  %s370_s23 = smov [#allocation2]  }
   0x3   :  { %s31_s22 = sshll.u32 %s369_s21, 4  ;;  %s19_s24 = sshll.u32 %s370_s23, 4  ;;  %s32_s22 = int_to_ptr.vmem [resolvable:$true] %s31_s22  ;;  %s410_s24 = int_to_ptr.vmem [resolvable:$true] %s19_s24 }
   0x4   :  { %s275_s27 = scalar_lea.hbm %s495_s1, 256 }
   0x5   :  { %p276_p0 = scmp.ne.s32.totalorder %s495_s1, %s275_s27  ;;  %p279_p1 = scmp.lt.u32.totalorder %s275_s27, %s495_s1 }
   0x7   :  { %p281_p2 = pnand %p279_p1, %p276_p0 }
   0x9   :  { %284 = shalt.err (!%p281_p2)
}
   0xa   :  { %s285_s8 = scalar_lea.vmem %s32_s22, 256  ;;  %p290_p4 = scmp.lt.s32.totalorder %s32_s22, %s32_s22 }
   0xb   :  { %p286_p3 = scmp.ne.s32.totalorder %s32_s22, %s285_s8  ;;  %p291_p5 = scmp.lt.s32.totalorder %s285_s8, %s285_s8 }
   0xd   :  { %p292_p6 = por %p291_p5, %p290_p4 }
   0xf   :  { %p293_p7 = pnand %p292_p6, %p286_p3 }
  0x11   :  { %296 = shalt.err (!%p293_p7)
}
  0x12   :  { %s371_s9 = smov 128   ;;  %s372_s10 = smov 8  }
  0x13   :  { %37 = dma.hbm_to_vmem [thread:$0]  %s495_s1, 256, %s32_s22, [#allocation6], %s371_s9, %s371_s9, %s372_s10  }
  0x14   :  { %s297_s15 = scalar_lea.hbm %s494_s0, 256 }
  0x15   :  { %p298_p8 = scmp.ne.s32.totalorder %s494_s0, %s297_s15  ;;  %p301_p9 = scmp.lt.u32.totalorder %s297_s15, %s494_s0 }
  0x17   :  { %p303_p10 = pnand %p301_p9, %p298_p8 }
  0x19   :  { %306 = shalt.err (!%p303_p10)
}
  0x1a   :  { %s307_s20 = scalar_lea.vmem %s410_s24, 256  ;;  %p312_p12 = scmp.lt.s32.totalorder %s410_s24, %s410_s24 }
  0x1b   :  { %p308_p11 = scmp.ne.s32.totalorder %s410_s24, %s307_s20  ;;  %p313_p13 = scmp.lt.s32.totalorder %s307_s20, %s307_s20 }
  0x1d   :  { %p314_p0 = por %p313_p13, %p312_p12 }
  0x1f   :  { %p315_p1 = pnand %p314_p0, %p308_p11 }
  0x21   :  { %318 = shalt.err (!%p315_p1)
}
  0x22   :  { %25 = dma.hbm_to_vmem [thread:$0]  %s494_s0, 256, %s410_s24, [#allocation3], %s371_s9, %s371_s9, %s372_s10  }
  0x23   :  { %s373_s22 = smov [#allocation7]   ;;  %s319_s27 = scalar_lea.hbm %s496_s2, 512 }
  0x24   :  { %s43_s23 = sshll.u32 %s373_s22, 4  ;;  %p320_p2 = scmp.ne.s32.totalorder %s496_s2, %s319_s27  ;;  %s44_s23 = int_to_ptr.vmem [resolvable:$true] %s43_s23 }
  0x25   :  { %p323_p3 = scmp.lt.u32.totalorder %s319_s27, %s496_s2 }
  0x27   :  { %p325_p4 = pnand %p323_p3, %p320_p2 }
  0x29   :  { %328 = shalt.err (!%p325_p4)
}
  0x2a   :  { %s329_s8 = scalar_lea.vmem %s44_s23, 512  ;;  %p334_p6 = scmp.lt.s32.totalorder %s44_s23, %s44_s23 }
  0x2b   :  { %p330_p5 = scmp.ne.s32.totalorder %s44_s23, %s329_s8  ;;  %p335_p7 = scmp.lt.s32.totalorder %s329_s8, %s329_s8 }
  0x2d   :  { %p336_p8 = por %p335_p7, %p334_p6 }
  0x2f   :  { %p337_p9 = pnand %p336_p8, %p330_p5 }
  0x31   :  { %340 = shalt.err (!%p337_p9)
}
  0x32   :  { %49 = dma.hbm_to_vmem [thread:$0]  %s496_s2, 512, %s44_s23, [#allocation6], %s371_s9, %s371_s9, %s372_s10  }
  0x33   :  { %363 = dma.done.wait [#allocation3], 256  }
  0x34   :  { %364 = vsyncadd [#allocation3], 4294967040 }
  0x35   :  { %365 = dma.done.wait [#allocation6], 768  }
  0x36   :  { %366 = vsyncadd [#allocation6], 4294966528  ;;  %vm78_vm0 = vcmask 261120   ;;  %v67_v0 = vld [vmem:[#allocation7] sm:$0xff]  ;;  %v68_v1 = vld [vmem:[#allocation7 + $0x8] sm:$0xff]  ;;  %s374_s15 = smov [#allocation8]  }
  0x37   :  { %v69_v2 = vld [vmem:[#allocation7 + $0x10] sm:$0xff]  ;;  %v257_v3 = vpack.c.bf16 %v68_v1, %v67_v0  ;;  %v70_v4 = vld [vmem:[#allocation7 + $0x18] sm:$0xff]  ;;  %v65_v5 = vld [vmem:[#allocation2] sm:$0xff]  ;;  %s222_s16 = sshll.u32 %s374_s15, 4  ;;  %s223_s16 = int_to_ptr.vmem [resolvable:$true] %s222_s16 }
  0x38   :  { %v261_v6 = vpack.c.bf16 %v70_v4, %v69_v2  ;;  %254 = vmatprep.mubr.msk.f32.mxu0 %vm78_vm0, %v65_v5  ;;  %v66_v7 = vld [vmem:[#allocation2 + $0x8] sm:$0xff]  ;;  %v235_v8 = vld [vmem:[%s497_s3] ss:$0 sm:$0xff]  ;;  %v161_v11 = vld [vmem:[#allocation5 + $0x8] sm:$0xff]  ;;  %p346_p11 = scmp.lt.s32.totalorder %s223_s16, %s223_s16 }
  0x39   :  { %258 = vmatprep.subr.bf16.mxu0 %v257_v3  ;;  %v160_v13 = vld [vmem:[#allocation5] sm:$0xff]  ;;  %v238_v41 = vld [vmem:[%s498_s4] ss:$0 sm:$0xff]  ;;  %s341_s4 = scalar_lea.vmem %s223_s16, 256 }
  0x3a   :  { %260 = vmatpush3.bf16.msra.mxu0 %v257_v3  ;;  %v239_v43 = vld [vmem:[%s499_s5] ss:$0 sm:$0xff]  ;;  %p342_p10 = scmp.ne.s32.totalorder %s223_s16, %s341_s4  ;;  %p347_p12 = scmp.lt.s32.totalorder %s341_s4, %s341_s4 }
  0x3b   :  { %262 = vmatprep.subr.bf16.mxu0 %v261_v6 }
  0x3c   :  { %p348_p13 = por %p347_p12, %p346_p11 }
  0x3e   :  { %264 = vmatpush3.bf16.msra.mxu0 %v261_v6  ;;  %p349_p0 = pnand %p348_p13, %p342_p10 }
  0x41   :  { %255 = vmatmul.mubr.msk.f32.vlgmr.msra.gmra.mrb[0].mxu0 %vm78_vm0, %v66_v7 }
 0x114   :  { %v256_v9 = vpop.f32.mrb[0].mxu0 }
 0x115   :  { %v157_v10 = vadd.f32 %v256_v9, %v235_v8  ;;  %v151_v12 = vpop.f32.mrb[1].mxu0 }
 0x116   :  { %v152_v14 = vadd.f32 %v235_v8, %v151_v12 }
 0x117   :  { %v163_v15 = vadd.f32 %v161_v11, %v157_v10 }
 0x118   :  { %v162_v16 = vadd.f32 %v160_v13, %v152_v14 }
 0x119   :  { %v174_v20 = vmul.f32 %v163_v15, %v163_v15  ;;  %v167_v21 = vsel %vm78_vm0, %v163_v15, 0.0 }
 0x11a   :  { %v164_v17 = vsel %vm78_vm0, %v162_v16, 0.0  ;;  %v173_v18 = vmul.f32 %v162_v16, %v162_v16 }
 0x11b   :  { %165 = vadd.xlane.f32.xlu0 %v164_v17  ;;  %v178_v22 = vsel %vm78_vm0, %v174_v20, 0.0 }
 0x11c   :  { %v175_v19 = vsel %vm78_vm0, %v173_v18, 0.0 }
 0x11d   :  { %176 = vadd.xlane.f32.xlu1 %v175_v19 }
 0x11f   :  { %168 = vadd.xlane.f32.xlu0 %v167_v21 }
 0x121   :  { %179 = vadd.xlane.f32.xlu1 %v178_v22 }
 0x1a8   :  { %v166_v23 = vpop.xlane.xlu0 %165 }
 0x1a9   :  { %v171_v24 = vmul.f32 0.03125, %v166_v23 }
 0x1aa   :  { %v177_v25 = vpop.xlane.xlu1 %176 }
 0x1ab   :  { %v183_v26 = vmul.f32 %v171_v24, %v171_v24  ;;  %v181_v27 = vmul.f32 0.03125, %v177_v25  ;;  %v193_v39 = vsub.f32 %v162_v16, %v171_v24 }
 0x1ac   :  { %v169_v28 = vpop.xlane.xlu0 %168 }
 0x1ad   :  { %v185_v29 = vsub.f32 %v181_v27, %v183_v26  ;;  %v172_v30 = vmul.f32 0.03125, %v169_v28 }
 0x1ae   :  { %v180_v31 = vpop.xlane.xlu1 %179 }
 0x1af   :  { %v187_v32 = vmax.f32 %v185_v29, 0.0  ;;  %v184_v33 = vmul.f32 %v172_v30, %v172_v30  ;;  %v182_v34 = vmul.f32 0.03125, %v180_v31  ;;  %v194_v44 = vsub.f32 %v163_v15, %v172_v30 }
 0x1b1   :  { %v189_v35 = vadd.f32 1e-12, %v187_v32  ;;  %v186_v36 = vsub.f32 %v182_v34, %v184_v33 }
 0x1b3   :  { %271 = vrsqrt.f32 %v189_v35  ;;  %v188_v37 = vmax.f32 %v186_v36, 0.0 }
 0x1b5   :  { %v190_v38 = vadd.f32 1e-12, %v188_v37 }
 0x1b7   :  { %273 = vrsqrt.f32 %v190_v38 }
 0x1bd   :  { %v272_v40 = vpop.eup %271 }
 0x1be   :  { %v195_v42 = vmul.f32 %v272_v40, %v193_v39 }
 0x1c0   :  { %v204_v45 = vmul.f32 %v238_v41, %v195_v42 }
 0x1c1   :  { %v274_v46 = vpop.eup %273 }
 0x1c2   :  { %v196_v47 = vmul.f32 %v274_v46, %v194_v44  ;;  %v213_v48 = vadd.f32 %v239_v43, %v204_v45 }
 0x1c4   :  { %v205_v49 = vmul.f32 %v238_v41, %v196_v47  ;;  %215 = vst.msk [vmem:[#allocation8] sm:$0xff] %vm78_vm0, %v213_v48 }
 0x1c6   :  { %v214_v50 = vadd.f32 %v239_v43, %v205_v49 }
 0x1c8   :  { %216 = vst.msk [vmem:[#allocation8 + $0x8] sm:$0xff] %vm78_vm0, %v214_v50 }
 0x1c9   :  { %352 = shalt.err (!%p349_p0)
}
 0x1ca   :  { %s353_s18 = scalar_lea.hbm %s500_s6, 256 }
 0x1cb   :  { %p354_p1 = scmp.ne.s32.totalorder %s500_s6, %s353_s18  ;;  %p357_p2 = scmp.lt.u32.totalorder %s353_s18, %s500_s6 }
 0x1cd   :  { %p359_p3 = pnand %p357_p2, %p354_p1 }
 0x1cf   :  { %362 = shalt.err (!%p359_p3)
}
 0x1d0   :  { %228 = dma.vmem_to_hbm [thread:$0]  %s223_s16, 256, %s500_s6, [#allocation4], %s371_s9, %s371_s9, %s372_s10  }
 0x1d1   :  { %367 = dma.done.wait [#allocation4], 256  }
 0x1d2   :  { %368 = vsyncadd [#allocation4], 4294967040 }
 0x1d3   :  { %232 = vsyncpa [#allocation3], 1 }
 0x1d4   :  { %233 = vsyncpa [#allocation6], 1 }
 0x1d5   :  { %234 = vsyncpa [#allocation4], 1 }

</bundles_post_ra>
